<compile_context>
chip_gen: v7x
topology: tpu7x:2x2x1
jax: 0.10.0
libtpu: 0.0.40
codegen_flags: <defaults>
</compile_context>

<pallas_src>
import jax
import jax.numpy as jnp
from jax import lax
from jax.experimental import pallas as pl
from jax.experimental.pallas import tpu as pltpu

NUM_CLASS = 18   # num_class in the PyTorch module
FUSE_CH = 16     # in-channels of fusion_conv1
BN_EPS = 1e-5


def _fusion_kernel(img_ref, ff_ref, pts_ref, w1_ref, w2_ref, b_ref, out_ref):
    """One batch chunk (TB elements) per grid step.

    img_ref : (TB, N1, 16)  img_encoder output, channels-last
    ff_ref  : (TB, N2, 16)  point_encoder fusion feature, channels-last
    pts_ref : (TB, C, L)    points_out, channels-first (L = N1 + N2)
    w1_ref  : (C, 16)       fusion_conv1 weight with BN folded in
    w2_ref  : (C, C)        fusion_conv2 weight with BN folded in
    b_ref   : (C, 2)        [:,0] = folded conv1 bias, [:,1] = folded conv2 bias
    out_ref : (TB, C, L)
    """
    w1 = w1_ref[...]                       # (C, 16)
    w2 = w2_ref[...]                       # (C, C)
    bb = b_ref[...]                        # (C, 2)
    b1 = bb[:, 0:1]                        # (C, 1)
    b2 = bb[:, 1:2]                        # (C, 1)

    tb = img_ref.shape[0]
    for b in range(tb):                    # static unroll, TB is small
        # cat([img_out, fusion_feature], dim=1): sublane-axis concat, (L, 16)
        fus = jnp.concatenate([img_ref[b], ff_ref[b]], axis=0)
        # Conv1d(16->C, 1) + folded BN:  (C,16) . (L,16)^T -> (C, L)
        x = lax.dot_general(w1, fus, (((1,), (1,)), ((), ())),
                            preferred_element_type=jnp.float32)
        x = jnp.maximum(x + b1, 0.0)       # ReLU
        x = x + pts_ref[b]                 # residual add (channels-first)
        # Conv1d(C->C, 1) + folded BN
        y = jnp.dot(w2, x, preferred_element_type=jnp.float32) + b2
        # Sigmoid via tanh (stable, runs on the EUP slot)
        y = 0.5 * (jnp.tanh(0.5 * y) + 1.0)
        out_ref[b] = y.astype(out_ref.dtype)


def fusion_head(img_out, fusion_feature, points_out, params):
    """img_out:(B,N1,16)  fusion_feature:(B,N2,16)  points_out:(B,C,L=N1+N2)."""
    B, N1, K = img_out.shape
    _, N2, _ = fusion_feature.shape
    Bp, C, L = points_out.shape
    assert Bp == B and K == FUSE_CH and C == NUM_CLASS and L == N1 + N2

    w1, b1, w2, b2, bn_scale, bn_shift = params
    # Fold eval-mode BatchNorm1d (same BN layer reused after both convs in the
    # PyTorch module) into the 1x1 conv weights/biases at trace time.
    w1f = w1 * bn_scale                       # (C, 16)
    b1f = bn_scale * b1 + bn_shift            # (C, 1)
    w2f = w2 * bn_scale                       # (C, C)
    b2f = bn_scale * b2 + bn_shift            # (C, 1)
    biases = jnp.concatenate([b1f, b2f], axis=1)   # (C, 2)

    # <=2 batch chunks: gives both v7x TensorCores a "parallel" step while
    # adding at most one extra (~0.35us) step on single-TC v5e/v6e.
    num_chunks = 2 if (B >= 2 and B % 2 == 0) else 1
    TB = B // num_chunks

    out = pl.pallas_call(
        _fusion_kernel,
        out_shape=jax.ShapeDtypeStruct((B, C, L), jnp.float32),
        grid_spec=pltpu.PrefetchScalarGridSpec(
            num_scalar_prefetch=0,
            grid=(num_chunks,),
            in_specs=[
                pl.BlockSpec((TB, N1, FUSE_CH), lambda b: (b, 0, 0)),
                pl.BlockSpec((TB, N2, FUSE_CH), lambda b: (b, 0, 0)),
                pl.BlockSpec((TB, C, L),        lambda b: (b, 0, 0)),
                pl.BlockSpec((C, FUSE_CH),      lambda b: (0, 0)),
                pl.BlockSpec((C, C),            lambda b: (0, 0)),
                pl.BlockSpec((C, 2),            lambda b: (0, 0)),
            ],
            out_specs=pl.BlockSpec((TB, C, L), lambda b: (b, 0, 0)),
        ),
        compiler_params=pltpu.CompilerParams(
            dimension_semantics=("parallel",)),
    )(img_out, fusion_feature, points_out, w1f, w2f, biases)

    # final permute(0, 2, 1): (B, C, L) -> (B, L, C)  (module output contract)
    return jnp.transpose(out, (0, 2, 1))


def reference(img_out, fusion_feature, points_out, params):
    """Pure-JAX reference of the PyTorch fusion head (eval-mode BN)."""
    w1, b1, w2, b2, bn_scale, bn_shift = params
    fus = jnp.concatenate([img_out, fusion_feature], axis=1)   # (B, L, 16)
    fus = jnp.transpose(fus, (0, 2, 1))                        # (B, 16, L)
    x = jnp.einsum('ck,bkl->bcl', w1, fus) + b1
    x = x * bn_scale + bn_shift
    x = jnp.maximum(x, 0.0) + points_out
    y = jnp.einsum('cd,bdl->bcl', w2, x) + b2
    y = y * bn_scale + bn_shift
    y = jax.nn.sigmoid(y)
    return jnp.transpose(y, (0, 2, 1))


def init_params(key):
    """Deterministic parameter init matching the PyTorch layer shapes."""
    k1, k2, k3, k4, k5, k6, k7, k8 = jax.random.split(key, 8)
    C = NUM_CLASS
    w1 = jax.random.normal(k1, (C, FUSE_CH), jnp.float32) * 0.1   # Conv1d(16,C,1).weight
    b1 = jax.random.normal(k2, (C, 1), jnp.float32) * 0.1         # Conv1d(16,C,1).bias
    w2 = jax.random.normal(k3, (C, C), jnp.float32) * 0.1         # Conv1d(C,C,1).weight
    b2 = jax.random.normal(k4, (C, 1), jnp.float32) * 0.1         # Conv1d(C,C,1).bias
    # BatchNorm1d(C) in eval mode, folded to per-channel scale/shift
    gamma = 1.0 + 0.05 * jax.random.normal(k5, (C, 1), jnp.float32)
    beta = 0.05 * jax.random.normal(k6, (C, 1), jnp.float32)
    running_mean = 0.05 * jax.random.normal(k7, (C, 1), jnp.float32)
    running_var = 1.0 + 0.05 * jax.random.uniform(k8, (C, 1), jnp.float32)
    bn_scale = gamma / jnp.sqrt(running_var + BN_EPS)
    bn_shift = beta - running_mean * bn_scale
    return (w1, b1, w2, b2, bn_scale, bn_shift)


if __name__ == "__main__":
    key = jax.random.PRNGKey(0)
    kp, ki, kf, kpt = jax.random.split(key, 4)

    B = 2
    N1 = 64          # tokens from img encoder
    N2 = 64          # tokens from point encoder fusion feature
    L = N1 + N2      # 128, lane-aligned

    params = init_params(kp)

    # Stand-ins for the (undefined) Res_50 / Point_model encoder outputs.
    img_out = jax.random.normal(ki, (B, N1, FUSE_CH), jnp.float32)
    fusion_feature = jax.random.normal(kf, (B, N2, FUSE_CH), jnp.float32)
    points_out = jax.random.normal(kpt, (B, NUM_CLASS, L), jnp.float32)

    out = fusion_head(img_out, fusion_feature, points_out, params)
    out = jax.block_until_ready(out)

    assert out.shape == (B, L, NUM_CLASS), out.shape
    assert bool(jnp.all(jnp.isfinite(out)))
    assert bool(jnp.all((out >= 0.0) & (out <= 1.0)))   # sigmoid range

    # Loose tolerance: MXU f32 matmuls may use multi-pass bf16 internally.
    ref = reference(img_out, fusion_feature, points_out, params)
    max_err = float(jnp.max(jnp.abs(out - ref)))
    assert max_err < 2e-2, max_err

    print("KERNEL_OK")
</pallas_src>

<mosaic_0001>
module attributes {stable_mosaic.version = 11 : i64} {
  func.func @_fusion_kernel(%arg0: i32, %arg1: memref<1x64x16xf32, #tpu.memory_space<vmem>>, %arg2: memref<1x64x16xf32, #tpu.memory_space<vmem>>, %arg3: memref<1x18x128xf32, #tpu.memory_space<vmem>>, %arg4: memref<18x16xf32, #tpu.memory_space<vmem>>, %arg5: memref<18x18xf32, #tpu.memory_space<vmem>>, %arg6: memref<18x2xf32, #tpu.memory_space<vmem>>, %arg7: memref<1x18x128xf32, #tpu.memory_space<vmem>>) attributes {dimension_semantics = [#tpu.dimension_semantics<parallel>], iteration_bounds = array<i64: 2>, scalar_prefetch = 0 : i64, scratch_operands = 0 : i64, tpu.core_type = #tpu.core_type<tc>, window_params = [{transform_indices = @transform_0, window_bounds = array<i64: 1, 64, 16>}, {transform_indices = @transform_1, window_bounds = array<i64: 1, 64, 16>}, {transform_indices = @transform_2, window_bounds = array<i64: 1, 18, 128>}, {pipeline_mode = #tpu.pipeline_mode<synchronous>, transform_indices = @transform_3, window_bounds = array<i64: 18, 16>}, {pipeline_mode = #tpu.pipeline_mode<synchronous>, transform_indices = @transform_4, window_bounds = array<i64: 18, 18>}, {pipeline_mode = #tpu.pipeline_mode<synchronous>, transform_indices = @transform_5, window_bounds = array<i64: 18, 2>}, {transform_indices = @transform_6, window_bounds = array<i64: 1, 18, 128>}]} {
    %c0 = arith.constant 0 : index
    %c0_0 = arith.constant 0 : index
    %0 = vector.load %arg4[%c0, %c0_0] : memref<18x16xf32, #tpu.memory_space<vmem>>, vector<18x16xf32>
    %c0_1 = arith.constant 0 : index
    %c0_2 = arith.constant 0 : index
    %1 = vector.load %arg5[%c0_1, %c0_2] : memref<18x18xf32, #tpu.memory_space<vmem>>, vector<18x18xf32>
    %c0_3 = arith.constant 0 : index
    %c0_4 = arith.constant 0 : index
    %2 = vector.load %arg6[%c0_3, %c0_4] : memref<18x2xf32, #tpu.memory_space<vmem>>, vector<18x2xf32>
    %3 = vector.extract_strided_slice %2 {offsets = [0, 0], sizes = [18, 1], strides = [1, 1]} : vector<18x2xf32> to vector<18x1xf32>
    %4 = vector.extract_strided_slice %2 {offsets = [0, 1], sizes = [18, 1], strides = [1, 1]} : vector<18x2xf32> to vector<18x1xf32>
    %c0_5 = arith.constant 0 : index
    %c0_6 = arith.constant 0 : index
    %c0_7 = arith.constant 0 : index
    %5 = vector.load %arg1[%c0_5, %c0_6, %c0_7] : memref<1x64x16xf32, #tpu.memory_space<vmem>>, vector<1x64x16xf32>
    %6 = vector.shape_cast %5 : vector<1x64x16xf32> to vector<64x16xf32>
    %c0_8 = arith.constant 0 : index
    %c0_9 = arith.constant 0 : index
    %c0_10 = arith.constant 0 : index
    %7 = vector.load %arg2[%c0_8, %c0_9, %c0_10] : memref<1x64x16xf32, #tpu.memory_space<vmem>>, vector<1x64x16xf32>
    %8 = vector.shape_cast %7 : vector<1x64x16xf32> to vector<64x16xf32>
    %9 = tpu.concatenate %6, %8 in 0 : vector<64x16xf32>, vector<64x16xf32> -> vector<128x16xf32>
    %cst = arith.constant dense<0.000000e+00> : vector<18x128xf32>
    %10 = tpu.matmul %0, %9, %cst {dimension_numbers = #tpu.dot_dimension_numbers<[1], [1], [0], [0], [0, 0, 1, 0], [], []>} : vector<18x16xf32>, vector<128x16xf32>, vector<18x128xf32> -> vector<18x128xf32>
    %11 = vector.broadcast %3 : vector<18x1xf32> to vector<18x128xf32>
    %12 = arith.addf %10, %11 : vector<18x128xf32>
    %cst_11 = arith.constant 0.000000e+00 : f32
    %13 = vector.broadcast %cst_11 : f32 to vector<18x128xf32>
    %14 = arith.maximumf %12, %13 : vector<18x128xf32>
    %c0_12 = arith.constant 0 : index
    %c0_13 = arith.constant 0 : index
    %c0_14 = arith.constant 0 : index
    %15 = vector.load %arg3[%c0_12, %c0_13, %c0_14] : memref<1x18x128xf32, #tpu.memory_space<vmem>>, vector<1x18x128xf32>
    %16 = vector.shape_cast %15 : vector<1x18x128xf32> to vector<18x128xf32>
    %17 = arith.addf %14, %16 : vector<18x128xf32>
    %cst_15 = arith.constant dense<0.000000e+00> : vector<18x128xf32>
    %18 = tpu.matmul %1, %17, %cst_15 {dimension_numbers = #tpu.dot_dimension_numbers<[1], [0], [0], [1], [0, 0, 1, 1], [], []>} : vector<18x18xf32>, vector<18x128xf32>, vector<18x128xf32> -> vector<18x128xf32>
    %19 = vector.broadcast %4 : vector<18x1xf32> to vector<18x128xf32>
    %20 = arith.addf %18, %19 : vector<18x128xf32>
    %cst_16 = arith.constant 5.000000e-01 : f32
    %21 = vector.broadcast %cst_16 : f32 to vector<18x128xf32>
    %22 = arith.mulf %21, %20 : vector<18x128xf32>
    %23 = math.tanh %22 : vector<18x128xf32>
    %cst_17 = arith.constant 1.000000e+00 : f32
    %24 = vector.broadcast %cst_17 : f32 to vector<18x128xf32>
    %25 = arith.addf %23, %24 : vector<18x128xf32>
    %cst_18 = arith.constant 5.000000e-01 : f32
    %26 = vector.broadcast %cst_18 : f32 to vector<18x128xf32>
    %27 = arith.mulf %26, %25 : vector<18x128xf32>
    %c0_19 = arith.constant 0 : index
    %c0_20 = arith.constant 0 : index
    %c0_21 = arith.constant 0 : index
    %28 = vector.load %arg7[%c0_19, %c0_20, %c0_21] : memref<1x18x128xf32, #tpu.memory_space<vmem>>, vector<1x18x128xf32>
    %29 = vector.shape_cast %28 : vector<1x18x128xf32> to vector<18x128xf32>
    %30 = vector.shape_cast %27 : vector<18x128xf32> to vector<1x18x128xf32>
    tpu.vector_store %arg7[%c0_19, %c0_20, %c0_21], %30 {strides = array<i32>} : memref<1x18x128xf32, #tpu.memory_space<vmem>>, vector<1x18x128xf32>,
    return
  }
  func.func @transform_0(%arg0: i32) -> (i32, i32, i32) {
    %c0_i32 = arith.constant 0 : i32
    %c0_i32_0 = arith.constant 0 : i32
    %c0_i32_1 = arith.constant 0 : i32
    return %arg0, %c0_i32, %c0_i32_0 : i32, i32, i32
  }
  func.func @transform_1(%arg0: i32) -> (i32, i32, i32) {
    %c0_i32 = arith.constant 0 : i32
    %c0_i32_0 = arith.constant 0 : i32
    %c0_i32_1 = arith.constant 0 : i32
    return %arg0, %c0_i32, %c0_i32_0 : i32, i32, i32
  }
  func.func @transform_2(%arg0: i32) -> (i32, i32, i32) {
    %c0_i32 = arith.constant 0 : i32
    %c0_i32_0 = arith.constant 0 : i32
    %c0_i32_1 = arith.constant 0 : i32
    return %arg0, %c0_i32, %c0_i32_0 : i32, i32, i32
  }
  func.func @transform_3(%arg0: i32) -> (i32, i32) {
    %c0_i32 = arith.constant 0 : i32
    %c0_i32_0 = arith.constant 0 : i32
    %c0_i32_1 = arith.constant 0 : i32
    return %c0_i32, %c0_i32_0 : i32, i32
  }
  func.func @transform_4(%arg0: i32) -> (i32, i32) {
    %c0_i32 = arith.constant 0 : i32
    %c0_i32_0 = arith.constant 0 : i32
    %c0_i32_1 = arith.constant 0 : i32
    return %c0_i32, %c0_i32_0 : i32, i32
  }
  func.func @transform_5(%arg0: i32) -> (i32, i32) {
    %c0_i32 = arith.constant 0 : i32
    %c0_i32_0 = arith.constant 0 : i32
    %c0_i32_1 = arith.constant 0 : i32
    return %c0_i32, %c0_i32_0 : i32, i32
  }
  func.func @transform_6(%arg0: i32) -> (i32, i32, i32) {
    %c0_i32 = arith.constant 0 : i32
    %c0_i32_0 = arith.constant 0 : i32
    %c0_i32_1 = arith.constant 0 : i32
    return %arg0, %c0_i32, %c0_i32_0 : i32, i32, i32
  }
}

</mosaic_0001>

<bundles_post_ra>
// kernel: tpu_custom_call.1
= control target key start
LH: loop header
LB: loop body
LE: loop exit
PB: predicated region body
PF: predicated region fallthrough
CT: control target
= control target key end

     0   :  { %s905_s21 = smov 0   ;;  %s1009_s0 = inlined_call_operand.vmem [shape: f32[2,64,16], index: 0, kind: input, shape index: {}]   ;;  %s1010_s1 = inlined_call_operand.vmem [shape: f32[2,64,16], index: 1, kind: input, shape index: {}]   ;;  %s1011_s2 = inlined_call_operand.vmem [shape: f32[2,18,128], index: 2, kind: input, shape index: {}]   ;;  %s1012_s3 = inlined_call_operand.vmem [shape: f32[18,16], index: 3, kind: input, shape index: {}]   ;;  %s1013_s4 = inlined_call_operand.vmem [shape: f32[18,18], index: 4, kind: input, shape index: {}]   ;;  %s1014_s5 = inlined_call_operand.vmem [shape: f32[18,2], index: 5, kind: input, shape index: {}]   ;;  %s1015_s6 = inlined_call_operand.vmem [shape: f32[2,18,128], index: 6, kind: output, shape index: {}]  }
   0x1 LB: > { %s679_s22 = sadd.s32 4294967295, %s863_s21   ;;  %p683_p0 = scmp.ge.s32.totalorder %s863_s21, 1  ;;  %s863_s21 = sphi %s905_s21, %s16_s21  }
   0x2   : > { %p232_p1 = scmp.lt.s32.totalorder %s863_s21, 3 }
   0x4   : > { %p233_p2 = pnand %p683_p0, %p232_p1 }
   0x5   : > { %p272_p3 = scmp.lt.s32.totalorder (!%p233_p2), %s679_s22, 1  ;;  %v865_v0 = vmov (!%p233_p2), 0.0|0.0   ;;  %vm866_vm0 = vmmov (!%p233_p2), 0   ;;  %v867_v1 = vmov (!%p233_p2), 0.0   ;;  %v868_v2 = vmov (!%p233_p2), 0   ;;  %v920_v3 = vld [vmem:[%s1014_s5] sm:$0xff] (!%p233_p2) }
   0x6   : > { %236 = sbr.rel (%p233_p2) target bundleno = 551 (0x227), region = 44  ;;  %798 = vmatprep.subr.bf16.mxu0 (!%p233_p2), %v865_v0  ;;  %774 = vmatprep.mubr.msk.f32.mxu0 (!%p233_p2), %vm866_vm0, %v867_v1  ;;  %v925_v4 = vld [vmem:[%s1014_s5 + $0x10] sm:$0x3] (!%p233_p2)  ;;  %vm332_vm1 = vcmask (!%p233_p2), 130048   ;;  %v299_v5 = vld [vmem:[%s1014_s5 + $0x8] sm:$0xff] (!%p233_p2)  ;;  %v292_v31 = vld [vmem:[%s1012_s3] sm:$0xff] (!%p233_p2) }
   0x7   : > { %847 = vset.pattern.permute.xlu0 (!%p233_p2), %v868_v2  ;;  %848 = vset.pattern.permute.xlu1 (!%p233_p2), %v868_v2  ;;  %vm940_vm2 = vmpackc.low (!%p233_p2), %vm332_vm1, %vm332_vm1  ;;  %v293_v32 = vld [vmem:[%s1012_s3 + $0x8] sm:$0xff] (!%p233_p2)  ;;  %v294_v33 = vld [vmem:[%s1012_s3 + $0x10] sm:$0x3] (!%p233_p2)  ;;  %v869_v34 = vmov (!%p233_p2), 1   ;;  %vm501_vm3 = vcmask (!%p233_p2), 1041408   ;;  %vm491_vm4 = vcmask (!%p233_p2), 146432  }
   0x8   : > { %319 = vperm.xlu0 (!%p233_p2), %847, %v920_v3   ;;  %329 = vperm.xlu1 (!%p233_p2), %848, %v925_v4   ;;  %v295_v57 = vld [vmem:[%s1013_s4] sm:$0xff] (!%p233_p2)  ;;  %v296_v58 = vld [vmem:[%s1013_s4 + $0x8] sm:$0xff] (!%p233_p2)  ;;  %v297_v59 = vld [vmem:[%s1013_s4 + $0x10] sm:$0x3] (!%p233_p2) }
   0x9   : > { %830 = vmatprep.subr.bf16.mxu1 (!%p233_p2), %v865_v0  ;;  %789 = vmatprep.mubr.msk.f32.mxu1 (!%p233_p2), %vm866_vm0, %v867_v1 }
   0xc   : > { %324 = vperm.xlu0 (!%p233_p2), %847, %v299_v5   ;;  %849 = vset.pattern.permute.xlu1 (!%p233_p2), %v869_v34 }
   0xd   : > { %s1019_s22 = smov (!%p272_p3, %s679_s22), 1  ;;  %480 = vperm.xlu1 %849, %v920_v3  }
   0xe   : > { %s715_s27 = sshll.u32 %s1019_s22, 6  ;;  %s833_s18 = smul.u32 24, %s1019_s22 }
   0xf   : > { %s276_s8 = scalar_lea.vmem %s1009_s0, %s715_s27  ;;  %s281_s11 = scalar_lea.vmem %s1010_s1, %s715_s27 }
  0x10   : > { %v301_v6 = vld [vmem:[%s276_s8] sm:$0xff]  ;;  %v302_v7 = vld [vmem:[%s276_s8 + $0x8] sm:$0xff]  ;;  %v303_v10 = vld [vmem:[%s276_s8 + $0x10] sm:$0xff]  ;;  %850 = vset.pattern.permute.xlu0 %v869_v34  ;;  %s286_s23 = scalar_lea.vmem %s1011_s2, %s833_s18 }
  0x11   : > { %v799_v9 = vpack.c.bf16 %v302_v7, %v301_v6  ;;  %v304_v11 = vld [vmem:[%s276_s8 + $0x18] sm:$0xff]  ;;  %v305_v13 = vld [vmem:[%s276_s8 + $0x20] sm:$0xff]  ;;  %v306_v14 = vld [vmem:[%s276_s8 + $0x28] sm:$0xff]  ;;  %484 = vperm.xlu0 %850, %v299_v5   ;;  %488 = vperm.xlu1 %849, %v925_v4  }
  0x12   : > { %v803_v12 = vpack.c.bf16 %v304_v11, %v303_v10  ;;  %v807_v15 = vpack.c.bf16 %v306_v14, %v305_v13  ;;  %v307_v16 = vld [vmem:[%s276_s8 + $0x30] sm:$0xff]  ;;  %v308_v17 = vld [vmem:[%s276_s8 + $0x38] sm:$0xff]  ;;  %v309_v19 = vld [vmem:[%s281_s11] sm:$0xff]  ;;  %s291_s8 = scalar_lea.vmem %s1015_s6, %s833_s18 }
  0x13   : > { %801 = vmatpush3.bf16.xpose.msk.msra.mxu0 %vm940_vm2, %v799_v9  ;;  %v811_v18 = vpack.c.bf16 %v308_v17, %v307_v16  ;;  %v310_v20 = vld [vmem:[%s281_s11 + $0x8] sm:$0xff]  ;;  %v311_v22 = vld [vmem:[%s281_s11 + $0x10] sm:$0xff]  ;;  %v312_v23 = vld [vmem:[%s281_s11 + $0x18] sm:$0xff] }
  0x14   : > { %802 = vmatprep.subr.bf16.mxu0 %v865_v0  ;;  %v815_v21 = vpack.c.bf16 %v310_v20, %v309_v19  ;;  %v819_v24 = vpack.c.bf16 %v312_v23, %v311_v22  ;;  %v313_v25 = vld [vmem:[%s281_s11 + $0x20] sm:$0xff]  ;;  %v314_v26 = vld [vmem:[%s281_s11 + $0x28] sm:$0xff]  ;;  %v315_v28 = vld [vmem:[%s281_s11 + $0x30] sm:$0xff] }
  0x15   : > { %v823_v27 = vpack.c.bf16 %v314_v26, %v313_v25  ;;  %v316_v29 = vld [vmem:[%s281_s11 + $0x38] sm:$0xff]  ;;  %v473_v44 = vld [vmem:[%s286_s23] sm:$0xff]  ;;  %v474_v45 = vld [vmem:[%s286_s23 + $0x8] sm:$0xff] }
  0x16   : > { %v827_v30 = vpack.c.bf16 %v316_v29, %v315_v28  ;;  %v475_v53 = vld [vmem:[%s286_s23 + $0x10] sm:$0x3] }
  0x1b   : > { %805 = vmatpush3.bf16.xpose.msk.msra.mxu0 %vm940_vm2, %v803_v12 }
  0x1c   : > { %806 = vmatprep.subr.bf16.mxu0 %v865_v0 }
  0x23   : > { %809 = vmatpush3.bf16.xpose.msk.msra.mxu0 %vm940_vm2, %v807_v15 }
  0x24   : > { %810 = vmatprep.subr.bf16.mxu0 %v865_v0 }
  0x2b   : > { %813 = vmatpush3.bf16.xpose.msk.msra.mxu0 %vm940_vm2, %v811_v18 }
  0x2c   : > { %814 = vmatprep.subr.bf16.mxu0 %v865_v0 }
  0x33   : > { %817 = vmatpush3.bf16.xpose.msk.msra.mxu0 %vm940_vm2, %v815_v21 }
  0x34   : > { %818 = vmatprep.subr.bf16.mxu0 %v865_v0 }
  0x3b   : > { %821 = vmatpush3.bf16.xpose.msk.msra.mxu0 %vm940_vm2, %v819_v24 }
  0x3c   : > { %822 = vmatprep.subr.bf16.mxu0 %v865_v0 }
  0x43   : > { %825 = vmatpush3.bf16.xpose.msk.msra.mxu0 %vm940_vm2, %v823_v27 }
  0x44   : > { %826 = vmatprep.subr.bf16.mxu0 %v865_v0 }
  0x4b   : > { %829 = vmatpush3.bf16.xpose.msk.msra.mxu0 %vm940_vm2, %v827_v30 }
  0x52   : > { %775 = vmatmul.mubr.msk.f32.vlgmr.msra.gmra.mrb[0].mxu0 %vm332_vm1, %v292_v31 }
  0x53   : > { %777 = vmatprep.mubr.msk.f32.mxu0 %vm866_vm0, %v867_v1 }
  0x56   : > { %778 = vmatmul.mubr.msk.f32.gmra.mrb[2].mxu0 %vm332_vm1, %v293_v32 }
  0x57   : > { %780 = vmatprep.mubr.msk.f32.mxu0 %vm866_vm0, %v867_v1 }
  0x5a   : > { %781 = vmatmul.mubr.msk.f32.gmra.mrb[4].mxu0 %vm332_vm1, %v294_v33 }
  0x87   : > { %v320_v35 = vpop.permute.xlu0 %319  ;;  %v330_v46 = vpop.permute.xlu1 %329 }
  0x8b   : > { %v325_v39 = vpop.permute.xlu0 %324 }
  0x8c   : > { %v481_v60 = vpop.permute.xlu1 %480 }
  0x90   : > { %v485_v0 = vpop.permute.xlu0 %484  ;;  %v489_v7 = vpop.permute.xlu1 %488 }
 0x125   : > { %v456_v36 = vpop.f32.mrb[0].mxu0 }
 0x126   : > { %v457_v37 = vadd.f32 %v456_v36, %v320_v35  ;;  %v776_v38 = vpop.f32.mrb[1].mxu0 }
 0x128   : > { %v470_v41 = vmax.f32 %v457_v37, 0.0 }
 0x129   : > { %v461_v40 = vpop.f32.mrb[2].mxu0 }
 0x12a   : > { %v462_v42 = vadd.f32 %v461_v40, %v325_v39  ;;  %v779_v43 = vpop.f32.mrb[3].mxu0  ;;  %v476_v49 = vadd.f32 %v473_v44, %v470_v41 }
 0x12c   : > { %v471_v47 = vmax.f32 %v462_v42, 0.0 }
 0x12d   : > { %v466_v48 = vpop.f32.mrb[4].mxu0 }
 0x12e   : > { %v477_v50 = vadd.f32 %v474_v45, %v471_v47  ;;  %v467_v51 = vadd.f32 %v466_v48, %v330_v46  ;;  %v782_v52 = vpop.f32.mrb[5].mxu0 }
 0x130   : > { %v472_v54 = vmax.f32 %v467_v51, 0.0  ;;  %v831_v55 = vpack.c.bf16 %v477_v50, %v476_v49 }
 0x132   : > { %v478_v56 = vadd.f32 %v475_v53, %v472_v54  ;;  %832 = vmatpush3.bf16.msra.mxu1 %v831_v55 }
 0x133   : > { %787 = vmatprep.subr.mxu1 %v867_v1 }
 0x136   : > { %788 = vmatpush3.msk.msra.mxu1 %vm501_vm3, %v478_v56 }
 0x137   : > { %790 = vmatmul.mubr.msk.f32.vlgmr.msra.gmra.mrb[0].mxu1 %vm491_vm4, %v295_v57 }
 0x138   : > { %792 = vmatprep.mubr.msk.f32.mxu1 %vm866_vm0, %v867_v1 }
 0x13b   : > { %793 = vmatmul.mubr.msk.f32.gmra.mrb[2].mxu1 %vm491_vm4, %v296_v58 }
 0x13c   : > { %795 = vmatprep.mubr.msk.f32.mxu1 %vm866_vm0, %v867_v1 }
 0x13f   : > { %796 = vmatmul.mubr.msk.f32.gmra.mrb[4].mxu1 %vm491_vm4, %v297_v59 }
 0x20a   : > { %v571_v61 = vpop.f32.mrb[0].mxu1 }
 0x20b   : > { %v572_v62 = vadd.f32 %v571_v61, %v481_v60  ;;  %v791_v63 = vpop.f32.mrb[1].mxu1 }
 0x20d   : > { %v585_v2 = vmul.f32 0.5, %v572_v62 }
 0x20e   : > { %v576_v3 = vpop.f32.mrb[2].mxu1 }
 0x20f   : > { %851 = vtanh.f32 %v585_v2  ;;  %v577_v4 = vadd.f32 %v576_v3, %v485_v0  ;;  %v794_v5 = vpop.f32.mrb[3].mxu1 }
 0x211   : > { %v586_v6 = vmul.f32 0.5, %v577_v4 }
 0x212   : > { %v581_v8 = vpop.f32.mrb[4].mxu1 }
 0x213   : > { %853 = vtanh.f32 %v586_v6  ;;  %v582_v1 = vadd.f32 %v581_v8, %v489_v7  ;;  %v797_v9 = vpop.f32.mrb[5].mxu1 }
 0x215   : > { %v587_v10 = vmul.f32 0.5, %v582_v1 }
 0x217   : > { %855 = vtanh.f32 %v587_v10 }
 0x219   : > { %v852_v11 = vpop.eup %851 }
 0x21a   : > { %v591_v12 = vadd.f32 1.0, %v852_v11 }
 0x21c   : > { %v594_v13 = vmul.f32 0.5, %v591_v12 }
 0x21d   : > { %v854_v14 = vpop.eup %853 }
 0x21e   : > { %597 = vst [vmem:[%s291_s8] sm:$0xff] %v594_v13  ;;  %v592_v15 = vadd.f32 1.0, %v854_v14 }
 0x220   : > { %v595_v16 = vmul.f32 0.5, %v592_v15 }
 0x221   : > { %v856_v17 = vpop.eup %855 }
 0x222   : > { %598 = vst [vmem:[%s291_s8 + $0x8] sm:$0xff] %v595_v16  ;;  %v593_v18 = vadd.f32 1.0, %v856_v17 }
 0x224   : > { %v596_v19 = vmul.f32 0.5, %v593_v18 }
 0x226   : > { %599 = vst [vmem:[%s291_s8 + $0x10] sm:$0x3] %v596_v19 }
 0x227 PF: > { %s16_s21 = sadd.s32 1, %s863_s21  }
 0x228   : > { %p13_p4 = scmp.ge.s32.totalorder %s16_s21, 4  }
 0x22a   :  { %15 = sbr.rel (!%p13_p4) target bundleno = 1 (0x1), region = 80 }

</bundles_post_ra>
